<compile_context>
chip_gen: v6e
topology: v6e:2x2x1
jax: 0.10.0
libtpu: 0.0.40
codegen_flags: <defaults>
</compile_context>

<pallas_src>
import numpy as np
import jax
import jax.numpy as jnp
from jax.experimental import pallas as pl
from jax.experimental.pallas import tpu as pltpu


_MASKED_KEY = np.int32(2**31 - 1)   # > any packed key built from a finite f32 dist


def _round_up(x, m):
    return (x + m - 1) // m * m


def _vmem_limit_bytes():
    """Scoped-VMEM budget: ~3/4 of physical (≈96 MiB v5e/v6e, ≈48 MiB v7x)."""
    try:
        cap = int(pltpu.get_tpu_info().vmem_capacity_bytes)
    except Exception:
        cap = 64 * 1024 * 1024          # conservative (v7x-sized) fallback
    return int(min(100 * 1024 * 1024, cap * 3 // 4))


def _inv_spec(block_shape, index_map):
    """BlockSpec for a (mostly) grid-invariant input: single-buffered."""
    return pl.BlockSpec(block_shape, index_map, pipeline_mode=pl.Buffered(1))


def _pick_row_tile(n, s, d1p, d2p, act_bytes, vmem_limit):
    """Row tile shared by the interp and MLP kernels (16-granular for bf16)."""
    n16 = _round_up(max(n, 1), 16)
    cin_p = d1p + d2p
    tn = 1024 if vmem_limit >= 80 * 1024 * 1024 else 512
    s_eff = max(s, 1)

    def interp_live(t):
        return (8 * t * s_eff * 4                     # [t,S] dist/key/select temps
                + s_eff * d2p * act_bytes             # pts2 (single-buffered)
                + 2 * t * (d1p + cin_p) * act_bytes   # pts1 + output (double-buffered)
                + 2 * t * 8 * 4)                      # xyz1_aug (double-buffered)

    while tn > 16 and interp_live(tn) > vmem_limit // 2:
        tn //= 2
    return min(tn, n16)


# ----------------------------- interpolation kernel --------------------------

def _nn3_weights(d, s_bits, approx):
    """d [tn,S] squared distances (>=0) -> [tn,S] normalized inverse-distance
    weights with exactly 3 non-zeros per row (the 3 nearest neighbors)."""
    tn, s = d.shape
    col = jax.lax.broadcasted_iota(jnp.int32, (tn, s), 1)
    low_mask = (1 << s_bits) - 1
    # key_mask clears both the low (column) bits and the SIGN bit, so -0.0 can
    # never masquerade as the global minimum key.
    key_mask = jnp.int32(((1 << 31) - 1) & ~low_mask)
    key = (pltpu.bitcast(d, jnp.int32) & key_mask) | col

    wmat = jnp.zeros((tn, s), jnp.float32)
    wsum = jnp.zeros((tn, 1), jnp.float32)
    for _ in range(3):
        kmin = jnp.min(key, axis=-1, keepdims=True)       # one lane-min per pass
        sel = col == (kmin & low_mask)                    # one-hot winner per row
        dmin = pltpu.bitcast(kmin & key_mask, jnp.float32)
        w = pl.reciprocal(jnp.maximum(dmin, 1e-10), approx=approx)
        wmat = jnp.where(sel, w, wmat)                    # built incrementally
        wsum = wsum + w
        key = jnp.where(sel, _MASKED_KEY, key)            # mask the winner
    return wmat * pl.reciprocal(wsum, approx=approx)


def _make_interp_kernel(s_bits, d1p, tn, n_valid, mm_dtype, approx):
    # TODO(synk): for very large S, tile S inside this kernel with a running
    # top-3 merge so wmat@pts2 skips the mostly-zero columns.
    need_mask = (n_valid % tn) != 0

    def compute(x1a_ref, x2a_ref, pts2_ref):
        # Single MXU matmul of augmented operands gives the full squared
        # distance:  [-2x | 1 | |x|^2 | 0] @ [y ; |y|^2 ; 1 ; 0]  (f32)
        d = jnp.maximum(
            jnp.dot(x1a_ref[0], x2a_ref[0], preferred_element_type=jnp.float32),
            0.0)
        wmat = _nn3_weights(d, s_bits, approx)
        if need_mask:
            # zero padded tail rows so they never reach the BN statistics
            row = (jax.lax.broadcasted_iota(jnp.int32, wmat.shape, 0)
                   + pl.program_id(1) * tn)
            wmat = jnp.where(row < n_valid, wmat, 0.0)
        return jnp.dot(wmat.astype(mm_dtype), pts2_ref[0],
                       preferred_element_type=jnp.float32)

    if d1p > 0:
        def kernel(x1a_ref, x2a_ref, pts2_ref, pts1_ref, out_ref):
            interp = compute(x1a_ref, x2a_ref, pts2_ref)
            # lane-aligned slice stores (d1p is a multiple of 128): no concat
            out_ref[0, :, :d1p] = pts1_ref[0].astype(out_ref.dtype)
            out_ref[0, :, d1p:] = interp.astype(out_ref.dtype)
    else:
        def kernel(x1a_ref, x2a_ref, pts2_ref, out_ref):
            out_ref[0] = compute(x1a_ref, x2a_ref, pts2_ref).astype(out_ref.dtype)
    return kernel


# --------------------------------- MLP kernels --------------------------------

def _make_matmul_stats_kernel(mm_dtype):
    """First layer: y = x @ W^T (bias dropped: BN cancels it) + column stats.
    Padded rows of x are exactly zero, so they add nothing to the stats."""
    def kernel(x_ref, wT_ref, y_ref, stats_ref):
        y = jnp.dot(x_ref[0].astype(mm_dtype), wT_ref[...],
                    preferred_element_type=jnp.float32)
        y_ref[0] = y.astype(y_ref.dtype)
        stats_ref[0, 0, 0:1, :] = jnp.sum(y, axis=0, keepdims=True)
        stats_ref[0, 0, 1:2, :] = jnp.sum(y * y, axis=0, keepdims=True)
    return kernel


def _make_fused_bn_relu_matmul_kernel(tn, n_valid, mm_dtype):
    """BN affine + ReLU of layer L fused with the matmul+stats of layer L+1:
    saves one full HBM round trip of the activation per layer."""
    need_mask = (n_valid % tn) != 0

    def kernel(y_ref, scale_ref, shift_ref, wT_ref, out_ref, stats_ref):
        z = jnp.maximum(
            y_ref[0].astype(jnp.float32) * scale_ref[...] + shift_ref[...], 0.0)
        if need_mask:
            row = (jax.lax.broadcasted_iota(jnp.int32, z.shape, 0)
                   + pl.program_id(1) * tn)
            z = jnp.where(row < n_valid, z, 0.0)   # keep padded rows zero
        y = jnp.dot(z.astype(mm_dtype), wT_ref[...],
                    preferred_element_type=jnp.float32)
        out_ref[0] = y.astype(out_ref.dtype)
        stats_ref[0, 0, 0:1, :] = jnp.sum(y, axis=0, keepdims=True)
        stats_ref[0, 0, 1:2, :] = jnp.sum(y * y, axis=0, keepdims=True)
    return kernel


def _final_bn_relu_kernel(y_ref, scale_ref, shift_ref, out_ref):
    z = y_ref[0].astype(jnp.float32) * scale_ref[...] + shift_ref[...]
    out_ref[0] = jnp.maximum(z, 0.0).astype(out_ref.dtype)


# ------------------------------ parameter prep --------------------------------

def init_params(key, in_channel, mlp):
    """Conv1d(last, out, 1) weight/bias (uniform +-1/sqrt(fan_in)) and
    BatchNorm gamma=1, beta=0 (PyTorch defaults)."""
    params = []
    last = in_channel
    for out_ch in mlp:
        key, k1, k2 = jax.random.split(key, 3)
        bound = 1.0 / np.sqrt(last)
        w = jax.random.uniform(k1, (out_ch, last), jnp.float32, -bound, bound)
        b = jax.random.uniform(k2, (out_ch,), jnp.float32, -bound, bound)
        gamma = jnp.ones((out_ch,), jnp.float32)
        beta = jnp.zeros((out_ch,), jnp.float32)
        params.append((w, b, gamma, beta))
        last = out_ch
    return params


def prepare_params(params, d1, d2, has_points1, use_bf16=True):
    """One-time prep: lane-pad channel dims to multiples of 128, store W^T
    (bf16 when use_bf16), drop the conv bias (BatchNorm cancels it exactly)."""
    act_dtype = jnp.bfloat16 if use_bf16 else jnp.float32
    d1p = _round_up(d1, 128) if has_points1 else 0
    d2p = _round_up(d2, 128)
    layers = []
    cin = (d1 + d2) if has_points1 else d2
    cin_p = d1p + d2p
    first = True
    for (w, _b, gamma, beta) in params:
        cout = w.shape[0]
        cout_p = _round_up(cout, 128)
        w_pad = jnp.zeros((cout_p, cin_p), jnp.float32)
        if first and has_points1:
            # padded feature layout: [p1 | 0... | interp | 0...]
            w_pad = w_pad.at[:cout, :d1].set(w[:, :d1])
            w_pad = w_pad.at[:cout, d1p:d1p + d2].set(w[:, d1:])
        else:
            w_pad = w_pad.at[:cout, :cin].set(w)
        gamma_p = jnp.zeros((cout_p,), jnp.float32).at[:cout].set(gamma)
        beta_p = jnp.zeros((cout_p,), jnp.float32).at[:cout].set(beta)
        layers.append((jnp.transpose(w_pad).astype(act_dtype),
                       gamma_p, beta_p, cout))
        cin, cin_p = cout, cout_p
        first = False
    return {"layers": layers, "d1p": d1p, "d2p": d2p, "act_dtype": act_dtype}


def _bn_coeffs(stats, gamma, beta, m):
    """Reduce per-tile sums/sumsqs -> per-column BN scale/shift (training mode,
    biased variance, eps=1e-5).  Tiny glue on [Cout]-sized vectors."""
    col_sum = jnp.sum(stats[:, :, 0, :], axis=(0, 1))
    col_sq = jnp.sum(stats[:, :, 1, :], axis=(0, 1))
    mean = col_sum / m
    var = jnp.maximum(col_sq / m - mean * mean, 0.0)
    inv = jax.lax.rsqrt(var + 1e-5)
    scale = gamma * inv
    shift = beta - mean * scale
    return scale.reshape(1, -1), shift.reshape(1, -1)


# --------------------------------- forward ------------------------------------

def pointnet_fp_forward(xyz1, xyz2, points1, points2, prepared):
    """xyz1:[B,3,N] xyz2:[B,3,S] points1:[B,D1,N]|None points2:[B,D2,S] -> [B,D',N]"""
    layers = prepared["layers"]
    d1p, d2p = prepared["d1p"], prepared["d2p"]
    act_dtype = prepared["act_dtype"]
    use_bf16 = act_dtype == jnp.bfloat16
    mm_dtype = jnp.bfloat16 if use_bf16 else jnp.float32
    act_bytes = 2 if use_bf16 else 4
    f32 = jnp.float32

    B, _, N = xyz1.shape
    S = xyz2.shape[2]
    D2 = points2.shape[1]
    has_p1 = points1 is not None
    assert has_p1 == (d1p > 0), "prepared params do not match points1 presence"
    D1 = points1.shape[1] if has_p1 else 0
    cin_p = d1p + d2p
    vmem_limit = _vmem_limit_bytes()

    # row tile shared by interp and MLP kernels (same grid -> no relayout)
    tn = _pick_row_tile(N, S, d1p, d2p, act_bytes, vmem_limit)
    n_pad = _round_up(N, tn)
    n_tiles = n_pad // tn

    cparams = pltpu.CompilerParams(
        dimension_semantics=("parallel", "parallel"),
        vmem_limit_bytes=vmem_limit)

    x1 = jnp.transpose(xyz1, (0, 2, 1)).astype(f32)            # [B,N,3]
    pts2_bsd = jnp.transpose(points2, (0, 2, 1)).astype(f32)   # [B,S,D2]
    pts2_pad = jnp.pad(pts2_bsd, ((0, 0), (0, 0), (0, d2p - D2))).astype(act_dtype)
    if has_p1:
        pts1_bnd = jnp.transpose(points1, (0, 2, 1)).astype(f32)
        pts1_pad = jnp.pad(
            pts1_bnd, ((0, 0), (0, n_pad - N), (0, d1p - D1))).astype(act_dtype)

    if S == 1:
        # trivial broadcast path (pure glue, padded rows stay zero)
        feats = jnp.zeros((B, n_pad, cin_p), f32)
        if has_p1:
            feats = feats.at[:, :N, :D1].set(pts1_bnd)
        feats = feats.at[:, :N, d1p:d1p + D2].set(
            jnp.broadcast_to(pts2_bsd, (B, N, D2)))
        feats = feats.astype(act_dtype)
    else:
        assert S >= 3, "PointNetFeaturePropagation needs S == 1 or S >= 3"
        s_bits = max(1, (S - 1).bit_length())

        # augmented distance operands (K padded to 8; MXU cost unchanged):
        #   x1_aug = [-2*x | 1 | |x|^2 | 0..],  x2_aug = [x ; |x|^2 ; 1 ; 0..]
        n1sq = jnp.sum(x1 * x1, axis=-1, keepdims=True)
        x1_aug = jnp.concatenate(
            [-2.0 * x1, jnp.ones((B, N, 1), f32), n1sq,
             jnp.zeros((B, N, 3), f32)], axis=-1)              # [B,N,8]
        x1_aug = jnp.pad(x1_aug, ((0, 0), (0, n_pad - N), (0, 0)))
        x2t = xyz2.astype(f32)                                  # [B,3,S]
        n2sq = jnp.sum(x2t * x2t, axis=1, keepdims=True)        # [B,1,S]
        x2_aug = jnp.concatenate(
            [x2t, n2sq, jnp.ones((B, 1, S), f32),
             jnp.zeros((B, 3, S), f32)], axis=1)                # [B,8,S]

        in_specs = [
            pl.BlockSpec((1, tn, 8), lambda b, i: (b, i, 0)),
            _inv_spec((1, 8, S), lambda b, i: (b, 0, 0)),
            _inv_spec((1, S, d2p), lambda b, i: (b, 0, 0)),
        ]
        args = [x1_aug, x2_aug, pts2_pad]
        if has_p1:
            in_specs.append(pl.BlockSpec((1, tn, d1p), lambda b, i: (b, i, 0)))
            args.append(pts1_pad)

        feats = pl.pallas_call(
            _make_interp_kernel(s_bits, d1p, tn, N, mm_dtype, approx=use_bf16),
            out_shape=jax.ShapeDtypeStruct((B, n_pad, cin_p), act_dtype),
            grid=(B, n_tiles),
            in_specs=in_specs,
            out_specs=pl.BlockSpec((1, tn, cin_p), lambda b, i: (b, i, 0)),
            compiler_params=cparams,
        )(*args)

    # ----- shared MLP: per layer  y_i = BNReLU(y_{i-1}) @ W_i^T  (fused) -----
    m_total = B * N
    num_layers = len(layers)

    def _stats_shape(cout_p):
        return jax.ShapeDtypeStruct((B, n_tiles, 2, cout_p), jnp.float32)

    # layer 0: plain matmul + per-tile column stats
    wT0, gamma0, beta0, cout_last = layers[0]
    cin0, cout0_p = wT0.shape
    y, stats = pl.pallas_call(
        _make_matmul_stats_kernel(mm_dtype),
        out_shape=(jax.ShapeDtypeStruct((B, n_pad, cout0_p), act_dtype),
                   _stats_shape(cout0_p)),
        grid=(B, n_tiles),
        in_specs=[
            pl.BlockSpec((1, tn, cin0), lambda b, i: (b, i, 0)),
            _inv_spec((cin0, cout0_p), lambda b, i: (0, 0)),
        ],
        out_specs=(
            pl.BlockSpec((1, tn, cout0_p), lambda b, i: (b, i, 0)),
            pl.BlockSpec((1, 1, 2, cout0_p), lambda b, i: (b, i, 0, 0)),
        ),
        compiler_params=cparams,
    )(feats, wT0)
    scale, shift = _bn_coeffs(stats, gamma0, beta0, m_total)

    # layers 1..L-1: fused BN+ReLU (layer i-1) -> matmul (layer i) -> stats
    for li in range(1, num_layers):
        wT, gamma, beta, cout = layers[li]
        cin_cur, cout_p = wT.shape
        y, stats = pl.pallas_call(
            _make_fused_bn_relu_matmul_kernel(tn, N, mm_dtype),
            out_shape=(jax.ShapeDtypeStruct((B, n_pad, cout_p), act_dtype),
                       _stats_shape(cout_p)),
            grid=(B, n_tiles),
            in_specs=[
                pl.BlockSpec((1, tn, cin_cur), lambda b, i: (b, i, 0)),
                _inv_spec((1, cin_cur), lambda b, i: (0, 0)),
                _inv_spec((1, cin_cur), lambda b, i: (0, 0)),
                _inv_spec((cin_cur, cout_p), lambda b, i: (0, 0)),
            ],
            out_specs=(
                pl.BlockSpec((1, tn, cout_p), lambda b, i: (b, i, 0)),
                pl.BlockSpec((1, 1, 2, cout_p), lambda b, i: (b, i, 0, 0)),
            ),
            compiler_params=cparams,
        )(y, scale, shift, wT)
        scale, shift = _bn_coeffs(stats, gamma, beta, m_total)
        cout_last = cout

    # final layer: standalone BN affine + ReLU (f32 output)
    cout_last_p = layers[-1][0].shape[1]
    out = pl.pallas_call(
        _final_bn_relu_kernel,
        out_shape=jax.ShapeDtypeStruct((B, n_pad, cout_last_p), jnp.float32),
        grid=(B, n_tiles),
        in_specs=[
            pl.BlockSpec((1, tn, cout_last_p), lambda b, i: (b, i, 0)),
            _inv_spec((1, cout_last_p), lambda b, i: (0, 0)),
            _inv_spec((1, cout_last_p), lambda b, i: (0, 0)),
        ],
        out_specs=pl.BlockSpec((1, tn, cout_last_p), lambda b, i: (b, i, 0)),
        compiler_params=cparams,
    )(y, scale, shift)

    # TODO(synk): optionally emit the NCW layout directly from the final kernel.
    out = out[:, :N, :cout_last]
    return jnp.transpose(out, (0, 2, 1))                       # [B, D', N]


# ------------------------------ numpy reference -------------------------------

def reference_forward(xyz1, xyz2, points1, points2, params):
    xyz1 = np.asarray(xyz1, np.float64)
    xyz2 = np.asarray(xyz2, np.float64)
    points2 = np.asarray(points2, np.float64)
    B, _, N = xyz1.shape
    S = xyz2.shape[2]
    x1 = np.transpose(xyz1, (0, 2, 1))
    x2 = np.transpose(xyz2, (0, 2, 1))
    p2 = np.transpose(points2, (0, 2, 1))
    if S == 1:
        interp = np.repeat(p2, N, axis=1)
    else:
        d = np.sum((x1[:, :, None, :] - x2[:, None, :, :]) ** 2, axis=-1)
        idx = np.argsort(d, axis=-1)[:, :, :3]
        dd = np.maximum(np.take_along_axis(d, idx, axis=-1), 1e-10)
        w = 1.0 / dd
        w = w / w.sum(-1, keepdims=True)
        bidx = np.arange(B)[:, None, None]
        gathered = p2[bidx, idx]                     # [B,N,3,D2]
        interp = np.sum(gathered * w[..., None], axis=2)
    if points1 is not None:
        p1 = np.transpose(np.asarray(points1, np.float64), (0, 2, 1))
        feat = np.concatenate([p1, interp], axis=-1)
    else:
        feat = interp
    x = feat.reshape(B * N, -1)
    for (w_, b_, g_, bt_) in params:
        w_ = np.asarray(w_, np.float64)
        b_ = np.asarray(b_, np.float64)
        g_ = np.asarray(g_, np.float64)
        bt_ = np.asarray(bt_, np.float64)
        y = x @ w_.T + b_
        mean = y.mean(0, keepdims=True)
        var = ((y - mean) ** 2).mean(0, keepdims=True)
        x = np.maximum((y - mean) / np.sqrt(var + 1e-5) * g_ + bt_, 0.0)
    return np.transpose(x.reshape(B, N, -1), (0, 2, 1))


# ----------------------------------- main --------------------------------------

def _run_case(name, key, B, N, S, D1, D2, mlp, has_p1, use_bf16, tol):
    k1, k2, k3, k4, kp = jax.random.split(key, 5)
    xyz1 = jax.random.normal(k1, (B, 3, N), jnp.float32)
    xyz2 = jax.random.normal(k2, (B, 3, S), jnp.float32)
    points1 = jax.random.normal(k3, (B, D1, N), jnp.float32) if has_p1 else None
    points2 = jax.random.normal(k4, (B, D2, S), jnp.float32)
    in_ch = (D1 if has_p1 else 0) + D2
    params = init_params(kp, in_ch, mlp)

    prepared = prepare_params(params, D1 if has_p1 else 0, D2, has_p1,
                              use_bf16=use_bf16)
    out = pointnet_fp_forward(xyz1, xyz2, points1, points2, prepared)
    out = jax.block_until_ready(out)
    assert out.shape == (B, mlp[-1], N), (name, out.shape)

    ref = reference_forward(xyz1, xyz2, points1, points2, params)
    np.testing.assert_allclose(np.asarray(out, np.float64), ref,
                               rtol=tol, atol=tol, err_msg=name)


if __name__ == "__main__":
    key = jax.random.PRNGKey(0)
    k_a, k_b = jax.random.split(key)

    # exact path (f32 matmuls, exact divides): tight check of the algorithm
    _run_case("f32", k_a, B=2, N=16, S=8, D1=4, D2=8, mlp=[32, 16],
              has_p1=True, use_bf16=False, tol=2e-3)
    # default perf path: bf16 MXU inputs / f32 accumulation, approx reciprocals
    _run_case("bf16", k_a, B=2, N=16, S=8, D1=4, D2=8, mlp=[32, 16],
              has_p1=True, use_bf16=True, tol=3e-2)
    # ragged rows (N not tile-aligned), no points1, odd S: exercises row masks
    _run_case("ragged", k_b, B=2, N=20, S=5, D1=0, D2=8, mlp=[16, 8],
              has_p1=False, use_bf16=True, tol=3e-2)

    print("KERNEL_OK")
</pallas_src>

<mosaic_0001>
module attributes {stable_mosaic.version = 11 : i64} {
  func.func @kernel(%arg0: i32, %arg1: i32, %arg2: memref<1x16x8xf32, #tpu.memory_space<vmem>>, %arg3: memref<1x8x8xf32, #tpu.memory_space<vmem>>, %arg4: memref<1x8x128xf32, #tpu.memory_space<vmem>>, %arg5: memref<1x16x128xf32, #tpu.memory_space<vmem>>, %arg6: memref<1x16x256xf32, #tpu.memory_space<vmem>>) attributes {dimension_semantics = [#tpu.dimension_semantics<parallel>, #tpu.dimension_semantics<parallel>], iteration_bounds = array<i64: 2, 1>, scalar_prefetch = 0 : i64, scratch_operands = 0 : i64, tpu.core_type = #tpu.core_type<tc>, window_params = [{transform_indices = @transform_0, window_bounds = array<i64: 1, 16, 8>}, {pipeline_mode = #tpu.pipeline_mode<synchronous>, transform_indices = @transform_1, window_bounds = array<i64: 1, 8, 8>}, {pipeline_mode = #tpu.pipeline_mode<synchronous>, transform_indices = @transform_2, window_bounds = array<i64: 1, 8, 128>}, {transform_indices = @transform_3, window_bounds = array<i64: 1, 16, 128>}, {transform_indices = @transform_4, window_bounds = array<i64: 1, 16, 256>}]} {
    %c0 = arith.constant 0 : index
    %c0_0 = arith.constant 0 : index
    %c0_1 = arith.constant 0 : index
    %0 = vector.load %arg2[%c0, %c0_0, %c0_1] : memref<1x16x8xf32, #tpu.memory_space<vmem>>, vector<1x16x8xf32>
    %1 = vector.shape_cast %0 : vector<1x16x8xf32> to vector<16x8xf32>
    %c0_2 = arith.constant 0 : index
    %c0_3 = arith.constant 0 : index
    %c0_4 = arith.constant 0 : index
    %2 = vector.load %arg3[%c0_2, %c0_3, %c0_4] : memref<1x8x8xf32, #tpu.memory_space<vmem>>, vector<1x8x8xf32>
    %3 = vector.shape_cast %2 : vector<1x8x8xf32> to vector<8x8xf32>
    %cst = arith.constant dense<0.000000e+00> : vector<16x8xf32>
    %4 = tpu.matmul %1, %3, %cst {dimension_numbers = #tpu.dot_dimension_numbers<[1], [0], [0], [1], [0, 0, 1, 1], [], []>} : vector<16x8xf32>, vector<8x8xf32>, vector<16x8xf32> -> vector<16x8xf32>
    %cst_5 = arith.constant 0.000000e+00 : f32
    %5 = vector.broadcast %cst_5 : f32 to vector<16x8xf32>
    %6 = arith.maximumf %4, %5 : vector<16x8xf32>
    %7 = tpu.iota {dimensions = array<i32: 1>} : vector<16x8xi32>
    %8 = tpu.bitcast %6 : vector<16x8xf32> -> vector<16x8xi32>
    %c2147483640_i32 = arith.constant 2147483640 : i32
    %9 = vector.broadcast %c2147483640_i32 : i32 to vector<16x8xi32>
    %10 = arith.andi %8, %9 : vector<16x8xi32>
    %11 = arith.ori %10, %7 : vector<16x8xi32>
    %cst_6 = arith.constant 0.000000e+00 : f32
    %12 = vector.broadcast %cst_6 : f32 to vector<16x8xf32>
    %cst_7 = arith.constant 0.000000e+00 : f32
    %13 = vector.broadcast %cst_7 : f32 to vector<16x1xf32>
    %cst_8 = arith.constant dense<2147483647> : vector<16xi32>
    %14 = vector.multi_reduction <minsi>, %11, %cst_8 [1] : vector<16x8xi32> to vector<16xi32>
    %15 = vector.shape_cast %14 : vector<16xi32> to vector<16x1xi32>
    %c7_i32 = arith.constant 7 : i32
    %16 = vector.broadcast %c7_i32 : i32 to vector<16x1xi32>
    %17 = arith.andi %15, %16 : vector<16x1xi32>
    %18 = vector.broadcast %17 : vector<16x1xi32> to vector<16x8xi32>
    %19 = arith.cmpi eq, %7, %18 : vector<16x8xi32>
    %c2147483640_i32_9 = arith.constant 2147483640 : i32
    %20 = vector.broadcast %c2147483640_i32_9 : i32 to vector<16x1xi32>
    %21 = arith.andi %15, %20 : vector<16x1xi32>
    %22 = tpu.bitcast %21 : vector<16x1xi32> -> vector<16x1xf32>
    %cst_10 = arith.constant 1.000000e-10 : f32
    %23 = vector.broadcast %cst_10 : f32 to vector<16x1xf32>
    %24 = arith.maximumf %22, %23 : vector<16x1xf32>
    %25 = tpu.reciprocal %24 : vector<16x1xf32> -> vector<16x1xf32>
    %26 = vector.shape_cast %25 : vector<16x1xf32> to vector<16x1xf32>
    %27 = vector.broadcast %26 : vector<16x1xf32> to vector<16x8xf32>
    %28 = arith.select %19, %27, %12 : vector<16x8xi1>, vector<16x8xf32>
    %29 = arith.addf %13, %25 : vector<16x1xf32>
    %c2147483647_i32 = arith.constant 2147483647 : i32
    %30 = vector.broadcast %c2147483647_i32 : i32 to vector<16x8xi32>
    %31 = arith.select %19, %30, %11 : vector<16x8xi1>, vector<16x8xi32>
    %cst_11 = arith.constant dense<2147483647> : vector<16xi32>
    %32 = vector.multi_reduction <minsi>, %31, %cst_11 [1] : vector<16x8xi32> to vector<16xi32>
    %33 = vector.shape_cast %32 : vector<16xi32> to vector<16x1xi32>
    %c7_i32_12 = arith.constant 7 : i32
    %34 = vector.broadcast %c7_i32_12 : i32 to vector<16x1xi32>
    %35 = arith.andi %33, %34 : vector<16x1xi32>
    %36 = vector.broadcast %35 : vector<16x1xi32> to vector<16x8xi32>
    %37 = arith.cmpi eq, %7, %36 : vector<16x8xi32>
    %c2147483640_i32_13 = arith.constant 2147483640 : i32
    %38 = vector.broadcast %c2147483640_i32_13 : i32 to vector<16x1xi32>
    %39 = arith.andi %33, %38 : vector<16x1xi32>
    %40 = tpu.bitcast %39 : vector<16x1xi32> -> vector<16x1xf32>
    %cst_14 = arith.constant 1.000000e-10 : f32
    %41 = vector.broadcast %cst_14 : f32 to vector<16x1xf32>
    %42 = arith.maximumf %40, %41 : vector<16x1xf32>
    %43 = tpu.reciprocal %42 : vector<16x1xf32> -> vector<16x1xf32>
    %44 = vector.shape_cast %43 : vector<16x1xf32> to vector<16x1xf32>
    %45 = vector.broadcast %44 : vector<16x1xf32> to vector<16x8xf32>
    %46 = arith.select %37, %45, %28 : vector<16x8xi1>, vector<16x8xf32>
    %47 = arith.addf %29, %43 : vector<16x1xf32>
    %c2147483647_i32_15 = arith.constant 2147483647 : i32
    %48 = vector.broadcast %c2147483647_i32_15 : i32 to vector<16x8xi32>
    %49 = arith.select %37, %48, %31 : vector<16x8xi1>, vector<16x8xi32>
    %cst_16 = arith.constant dense<2147483647> : vector<16xi32>
    %50 = vector.multi_reduction <minsi>, %49, %cst_16 [1] : vector<16x8xi32> to vector<16xi32>
    %51 = vector.shape_cast %50 : vector<16xi32> to vector<16x1xi32>
    %c7_i32_17 = arith.constant 7 : i32
    %52 = vector.broadcast %c7_i32_17 : i32 to vector<16x1xi32>
    %53 = arith.andi %51, %52 : vector<16x1xi32>
    %54 = vector.broadcast %53 : vector<16x1xi32> to vector<16x8xi32>
    %55 = arith.cmpi eq, %7, %54 : vector<16x8xi32>
    %c2147483640_i32_18 = arith.constant 2147483640 : i32
    %56 = vector.broadcast %c2147483640_i32_18 : i32 to vector<16x1xi32>
    %57 = arith.andi %51, %56 : vector<16x1xi32>
    %58 = tpu.bitcast %57 : vector<16x1xi32> -> vector<16x1xf32>
    %cst_19 = arith.constant 1.000000e-10 : f32
    %59 = vector.broadcast %cst_19 : f32 to vector<16x1xf32>
    %60 = arith.maximumf %58, %59 : vector<16x1xf32>
    %61 = tpu.reciprocal %60 : vector<16x1xf32> -> vector<16x1xf32>
    %62 = vector.shape_cast %61 : vector<16x1xf32> to vector<16x1xf32>
    %63 = vector.broadcast %62 : vector<16x1xf32> to vector<16x8xf32>
    %64 = arith.select %55, %63, %46 : vector<16x8xi1>, vector<16x8xf32>
    %65 = arith.addf %47, %61 : vector<16x1xf32>
    %66 = tpu.reciprocal %65 : vector<16x1xf32> -> vector<16x1xf32>
    %67 = vector.broadcast %66 : vector<16x1xf32> to vector<16x8xf32>
    %68 = arith.mulf %64, %67 : vector<16x8xf32>
    %c0_20 = arith.constant 0 : index
    %c0_21 = arith.constant 0 : index
    %c0_22 = arith.constant 0 : index
    %69 = vector.load %arg4[%c0_20, %c0_21, %c0_22] : memref<1x8x128xf32, #tpu.memory_space<vmem>>, vector<1x8x128xf32>
    %70 = vector.shape_cast %69 : vector<1x8x128xf32> to vector<8x128xf32>
    %cst_23 = arith.constant dense<0.000000e+00> : vector<16x128xf32>
    %71 = tpu.matmul %68, %70, %cst_23 {dimension_numbers = #tpu.dot_dimension_numbers<[1], [0], [0], [1], [0, 0, 1, 1], [], []>} : vector<16x8xf32>, vector<8x128xf32>, vector<16x128xf32> -> vector<16x128xf32>
    %c0_24 = arith.constant 0 : index
    %c0_25 = arith.constant 0 : index
    %c0_26 = arith.constant 0 : index
    %72 = vector.load %arg5[%c0_24, %c0_25, %c0_26] : memref<1x16x128xf32, #tpu.memory_space<vmem>>, vector<1x16x128xf32>
    %73 = vector.shape_cast %72 : vector<1x16x128xf32> to vector<16x128xf32>
    %c0_27 = arith.constant 0 : index
    %c0_28 = arith.constant 0 : index
    %c0_29 = arith.constant 0 : index
    %74 = vector.load %arg6[%c0_27, %c0_28, %c0_29] : memref<1x16x256xf32, #tpu.memory_space<vmem>>, vector<1x16x128xf32>
    %75 = vector.shape_cast %74 : vector<1x16x128xf32> to vector<16x128xf32>
    %76 = vector.shape_cast %73 : vector<16x128xf32> to vector<1x16x128xf32>
    tpu.vector_store %arg6[%c0_27, %c0_28, %c0_29], %76 {strides = array<i32>} : memref<1x16x256xf32, #tpu.memory_space<vmem>>, vector<1x16x128xf32>,
    %c0_30 = arith.constant 0 : index
    %c0_31 = arith.constant 0 : index
    %c128 = arith.constant 128 : index
    %77 = vector.load %arg6[%c0_30, %c0_31, %c128] : memref<1x16x256xf32, #tpu.memory_space<vmem>>, vector<1x16x128xf32>
    %78 = vector.shape_cast %77 : vector<1x16x128xf32> to vector<16x128xf32>
    %79 = vector.shape_cast %71 : vector<16x128xf32> to vector<1x16x128xf32>
    tpu.vector_store %arg6[%c0_30, %c0_31, %c128], %79 {strides = array<i32>} : memref<1x16x256xf32, #tpu.memory_space<vmem>>, vector<1x16x128xf32>,
    return
  }
  func.func @transform_0(%arg0: i32, %arg1: i32) -> (i32, i32, i32) {
    %c0_i32 = arith.constant 0 : i32
    %c0_i32_0 = arith.constant 0 : i32
    return %arg0, %arg1, %c0_i32 : i32, i32, i32
  }
  func.func @transform_1(%arg0: i32, %arg1: i32) -> (i32, i32, i32) {
    %c0_i32 = arith.constant 0 : i32
    %c0_i32_0 = arith.constant 0 : i32
    %c0_i32_1 = arith.constant 0 : i32
    return %arg0, %c0_i32, %c0_i32_0 : i32, i32, i32
  }
  func.func @transform_2(%arg0: i32, %arg1: i32) -> (i32, i32, i32) {
    %c0_i32 = arith.constant 0 : i32
    %c0_i32_0 = arith.constant 0 : i32
    %c0_i32_1 = arith.constant 0 : i32
    return %arg0, %c0_i32, %c0_i32_0 : i32, i32, i32
  }
  func.func @transform_3(%arg0: i32, %arg1: i32) -> (i32, i32, i32) {
    %c0_i32 = arith.constant 0 : i32
    %c0_i32_0 = arith.constant 0 : i32
    return %arg0, %arg1, %c0_i32 : i32, i32, i32
  }
  func.func @transform_4(%arg0: i32, %arg1: i32) -> (i32, i32, i32) {
    %c0_i32 = arith.constant 0 : i32
    %c0_i32_0 = arith.constant 0 : i32
    return %arg0, %arg1, %c0_i32 : i32, i32, i32
  }
}

</mosaic_0001>

<bundles_post_ra>
// kernel: tpu_custom_call.1
= control target key start
LH: loop header
LB: loop body
LE: loop exit
PB: predicated region body
PF: predicated region fallthrough
CT: control target
= control target key end

     0   :  { %9 = vsyncpa [#allocation3], 0  ;;  %s1248_s0 = inlined_call_operand.vmem [shape: f32[2,16,8], index: 0, kind: input, shape index: {}]   ;;  %s1249_s1 = inlined_call_operand.vmem [shape: f32[2,8,8], index: 1, kind: input, shape index: {}]   ;;  %s1250_s2 = inlined_call_operand.hbm [shape: f32[2,8,128], index: 2, kind: input, shape index: {}]   ;;  %s1251_s3 = inlined_call_operand.vmem [shape: f32[2,16,128], index: 3, kind: input, shape index: {}]   ;;  %s1252_s4 = inlined_call_operand.hbm [shape: f32[2,16,256], index: 4, kind: output, shape index: {}]  }
   0x1   :  { %10 = vsyncpa [#allocation4], 0 }
   0x2   :  { %12 = vsyncpa [#allocation4 + $0x1], 0  ;;  %s1031_s15 = smov 0   ;;  %s1033_s16 = smov 0  }
   0x3   :  { %s1035_s17 = smov 0   ;;  %s1037_s18 = smov 0  }
   0x4   :  { %s1039_s19 = smov 0   ;;  %s1041_s20 = smov 0  }
   0x5 LB: > { %s772_s21 = sadd.s32 4294967295, %s1000_s20   ;;  %s773_s22 = sadd.s32 4294967294, %s1000_s20   ;;  %s1000_s20 = sphi %s1041_s20, %s18_s20   ;;  %s996_s19 = sphi %s1039_s19, %s1276_s19   ;;  %s992_s18 = sphi %s1037_s18, %s1275_s18   ;;  %s988_s17 = sphi %s1035_s17, %s1274_s17   ;;  %s984_s16 = sphi %s1033_s16, %s1273_s16   ;;  %s980_s15 = sphi %s1031_s15, %s1272_s15  }
   0x6   : > { %s30_s23 = sadd.s32 1, %s996_s19  ;;  %s91_s24 = sadd.s32 1, %s988_s17 }
   0x7   : > { %p32_p0 = scmp.ge.s32.totalorder %s30_s23, 2  ;;  %p104_p1 = scmp.ne.s32.totalorder %s984_s16, %s980_s15 }
   0x8   : > { %p157_p2 = scmp.ne.s32.totalorder %s988_s17, %s984_s16  ;;  %p105_p3 = scmp.eq.s32.totalorder %s772_s21, 0 }
   0x9   : > { %s1278_s23 = smov (%p32_p0, %s30_s23), 0  ;;  %p158_p4 = scmp.eq.s32.totalorder %s772_s21, 1 }
   0xa   : > { %s88_s25 = ssub.s32 %s996_s19, %s1278_s23  ;;  %p164_p5 = scmp.eq.s32.totalorder %s773_s22, 1 }
   0xb   : > { %p89_p6 = scmp.eq.s32.totalorder %s88_s25, 0  ;;  %p1073_p7 = por %p158_p4, %p157_p2 }
   0xc   : > { %p1080_p8 = por %p164_p5, %p104_p1  ;;  %p774_p9 = scmp.ge.s32.totalorder %s1000_s20, 1 }
   0xd   : > { %s1257_s26 = scalar_select %p1073_p7, 1, 0 }
   0xe   : > { %s1258_s27 = scalar_select %p1080_p8, 1, 0 }
   0xf   : > { %s1086_s28 = scalar_select %p89_p6, %s988_s17, %s91_s24  }
  0x10   : > { %p171_p10 = scmp.lt.s32.totalorder %s1000_s20, 3  ;;  %p1092_p11 = por %p105_p3, %p104_p1 }
  0x11   : > { %s775_s5 = sshll.u32 %s992_s18, 7  ;;  %s1002_s6 = smov [#allocation2]  }
  0x12   : > { %s1259_s29 = scalar_select %p1092_p11, 1, 0 }
  0x13   : > { %p1096_p12 = pnand %p774_p9, %p171_p10  ;;  %s193_s7 = sshll.u32 %s1002_s6, 4  ;;  %s194_s7 = int_to_ptr.vmem [resolvable:$true] %s193_s7 }
  0x14   : > { %s191_s10 = scalar_lea.hbm %s1250_s2, %s775_s5  ;;  %s897_s21 = scalar_lea.hbm %s1250_s2, 256 }
  0x15   : > { %s1260_s30 = scalar_select %p1096_p12, 1, 0 }
  0x16   : > { %p816_p13 = pneg %p1096_p12  ;;  %s892_s12 = scalar_lea.hbm %s191_s10, 128 }
  0x17   : > { %p893_p1 = scmp.ne.s32.totalorder %s191_s10, %s892_s12  ;;  %p898_p5 = scmp.lt.s32.totalorder %s191_s10, %s1250_s2 }
  0x18   : > { %p1108_p0 = pnand %p816_p13, %p1092_p11  ;;  %p899_p6 = scmp.lt.s32.totalorder %s897_s21, %s892_s12 }
  0x1a   : > { %p894_p2 = pneg %p1108_p0  ;;  %p900_p9 = por %p899_p6, %p898_p5 }
  0x1c   : > { %p895_p3 = pnand %p894_p2, %p893_p1 }
  0x1e   : > { %p896_p4 = pneg %p895_p3 }
  0x20   : > { %p901_p10 = pnand %p900_p9, %p896_p4 }
  0x22   : > { %904 = shalt.err (!%p901_p10)
}
  0x23   : > { %s905_s25 = scalar_lea.vmem %s194_s7, 128  ;;  %p913_p11 = scmp.lt.s32.totalorder %s194_s7, %s194_s7 }
  0x24   : > { %p906_p13 = scmp.ne.s32.totalorder %s194_s7, %s905_s25  ;;  %p914_p12 = scmp.lt.s32.totalorder %s905_s25, %s905_s25 }
  0x26   : > { %p908_p8 = pnand %p906_p13, %p894_p2  ;;  %p915_p1 = por %p914_p12, %p913_p11 }
  0x28   : > { %p909_p7 = pneg %p908_p8 }
  0x2a   : > { %p916_p3 = pnand %p915_p1, %p909_p7 }
  0x2c   : > { %919 = shalt.err (!%p916_p3)
}
  0x2d   : > { %819 = dma.hbm_to_vmem [thread:$0]  (!%p1108_p0), %s191_s10, 128, %s194_s7, [#allocation3]  }
  0x2e   : > { %p1262_p5 = scmp.ne.s32.totalorder %s1260_s30, 0 }
  0x2f   : > { %p1263_p6 = scmp.ne.s32.totalorder (!%p1262_p5), %s1259_s29, 0 }
  0x30   : > { %232 = sbr.rel (%p1262_p5) target bundleno = 1382 (0x566), region = 36 }
  0x35   : > { %971 = dma.done.wait (%p1263_p6), [#allocation3], 128  }
  0x36   : > { %973 = vsyncadd (%p1263_p6), [#allocation3], 4294967168  ;;  %p276_p8 = scmp.lt.s32.totalorder %s992_s18, 1  ;;  %s272_s5 = sand.u32 1, %s984_s16   ;;  %vm303_vm0 = vcmask 64512   ;;  %v387_v5 = vlaneseq }
  0x37   : > { %s778_s8 = sshll.u32 %s272_s5, 5  ;;  %s1203_s10 = scalar_lea.sflag [#allocation4], %s272_s5 }
  0x38   : > { %s277_s6 = scalar_select %p276_p8, %s992_s18, 1  ;;  %v1148_v8 = vand.u32 127, %v387_v5 }
  0x39   : > { %s1143_s24 = scalar_lea.vmem [#allocation5], %s778_s8  ;;  %p1270_p11 = scmp.ne.s32.totalorder %s1257_s26, 0 }
  0x3a   : > { %s781_s9 = sshll.u32 %s277_s6, 3  ;;  %s793_s7 = sshll.u32 %s277_s6, 4 }
  0x3b   : > { %s288_s11 = scalar_lea.vmem %s1249_s1, %s781_s9  ;;  %s283_s29 = scalar_lea.vmem %s1248_s0, %s793_s7 }
  0x3c   : > { %s297_s22 = scalar_lea.vmem %s1251_s3, %s793_s7  ;;  %v302_v0 = vld [vmem:[%s288_s11] sm:$0xff]  ;;  %v301_v2 = vld [vmem:[%s283_s29 + $0x8] sm:$0xff]  ;;  %s646_s25 = sshll.u32 %s1143_s24, 4  ;;  %s1192_s25 = int_to_ptr.vmem [resolvable:$true] %s646_s25 }
  0x3d   : > { %v300_v1 = vld [vmem:[%s283_s29] sm:$0xff]  ;;  %802 = vmatprep.subr.mxu0 %v302_v0  ;;  %v624_v4 = vld [vmem:[%s297_s22 + $0x8] sm:$0xff]  ;;  %s795_s6 = sshll.u32 %s992_s18, 9  ;;  %s920_s30 = scalar_lea.vmem %s1192_s25, 512 }
  0x3e   : > { %804 = vmatprep.mubr.msk.f32.mxu0 %vm303_vm0, %v300_v1  ;;  %v623_v3 = vld [vmem:[%s297_s22] sm:$0xff]  ;;  %803 = vmatpush3.msra.mxu0 %v302_v0  ;;  %626 = vst [vmem:[%s1143_s24 + $0x10] sm:$0xff] %v624_v4  ;;  %s1197_s7 = scalar_lea.hbm %s1252_s4, %s795_s6  ;;  %p921_p7 = scmp.ne.s32.totalorder %s1192_s25, %s920_s30 }
  0x3f   : > { %625 = vst [vmem:[%s1143_s24] sm:$0xff] %v623_v3  ;;  %805 = vmatmul.mubr.msk.f32.vlgmr.msra.gmra.mxu0 %vm303_vm0, %v301_v2  ;;  %s1003_s18 = smov [#allocation5]  }
  0x40   : > { %p922_p12 = pnand %p921_p7, %p1270_p11  ;;  %s924_s11 = sshll.u32 %s1003_s18, 4  ;;  %s925_s11 = int_to_ptr.vmem [resolvable:$false] %s924_s11 }
  0x41   : > { %s926_s12 = scalar_lea.vmem %s925_s11, 1024  ;;  %p927_p2 = scmp.lt.s32.totalorder %s1192_s25, %s925_s11 }
  0x42   : > { %p923_p0 = pneg %p922_p12  ;;  %p928_p4 = scmp.lt.s32.totalorder %s926_s12, %s920_s30 }
  0x44   : > { %p929_p9 = por %p928_p4, %p927_p2 }
  0x46   : > { %p930_p10 = pnand %p929_p9, %p923_p0 }
  0xff   : > { %v806_v6 = vpop.f32.mrf.mxu0 }
 0x100   : > { %v386_v7 = vmax.f32 %v806_v6, 0.0 }
 0x101   : > { %v376_v9 = vpop.f32.mrf.mxu0 }
 0x102   : > { %v392_v10 = vand.u32 2147483640, %v386_v7  ;;  %v385_v11 = vmax.f32 %v376_v9, 0.0 }
 0x104   : > { %v394_v12 = vor.u32 %v392_v10, %v1148_v8  ;;  %v391_v13 = vand.u32 2147483640, %v385_v11 }
 0x106   : > { %v393_v14 = vor.u32 %v391_v13, %v1148_v8  ;;  %v410_v16 = vsel %vm303_vm0, %v394_v12, 2147483647 }
 0x107   : > { %v412_v19 = vshra.s32 %v410_v16, 16  ;;  %v411_v24 = vand.u32 65535, %v410_v16 }
 0x108   : > { %v395_v15 = vsel %vm303_vm0, %v393_v14, 2147483647 }
 0x109   : > { %v397_v17 = vshra.s32 %v395_v15, 16  ;;  %v414_v20 = vcvt.s32.f32 %v412_v19  ;;  %v396_v21 = vand.u32 65535, %v395_v15  ;;  %v413_v27 = vcvt.s32.f32 %v411_v24 }
 0x10b   : > { %v399_v18 = vcvt.s32.f32 %v397_v17  ;;  %v398_v23 = vcvt.s32.f32 %v396_v21 }
 0x10d   : > { %400 = vmin.xlane.f32.xlu0 %v399_v18 }
 0x111   : > { %415 = vmin.xlane.f32.xlu0 %v414_v20 }
 0x196   : > { %v401_v22 = vpop.xlane.xlu0 %400 }
 0x197   : > { %vm402_vm1 = vcmp.eq.f32.partialorder %v399_v18, %v401_v22  ;;  %v407_v29 = vcvt.f32.s32 %v401_v22 }
 0x198   : > { %v403_v25 = vsel %vm402_vm1, %v398_v23, inf }
 0x199   : > { %404 = vmin.xlane.f32.xlu1 %v403_v25  ;;  %v408_v31 = vshll.u32 %v407_v29, 16 }
 0x19a   : > { %v416_v26 = vpop.xlane.xlu0 %415 }
 0x19b   : > { %vm417_vm2 = vcmp.eq.f32.partialorder %v414_v20, %v416_v26  ;;  %v422_v32 = vcvt.f32.s32 %v416_v26 }
 0x19c   : > { %v418_v28 = vsel %vm417_vm2, %v413_v27, inf }
 0x19d   : > { %419 = vmin.xlane.f32.xlu1 %v418_v28  ;;  %v423_v36 = vshll.u32 %v422_v32, 16 }
 0x222   : > { %v405_v30 = vpop.xlane.xlu1 %404 }
 0x223   : > { %v406_v33 = vcvt.f32.s32 %v405_v30 }
 0x225   : > { %v409_v34 = vadd.s32 %v408_v31, %v406_v33 }
 0x226   : > { %v420_v35 = vpop.xlane.xlu1 %419 }
 0x227   : > { %v425_v37 = vand.u32 7, %v409_v34  ;;  %v429_v38 = vand.u32 2147483640, %v409_v34  ;;  %v421_v39 = vcvt.f32.s32 %v420_v35 }
 0x229   : > { %v433_v40 = vmax.f32 %v429_v38, 1e-10  ;;  %v424_v41 = vadd.s32 %v423_v36, %v421_v39  ;;  %vm1155_vm3 = vcmp.eq.s32.totalorder %v1148_v8, %v425_v37 }
 0x22a   : > { %v441_v43 = vsel %vm1155_vm3, 2147483647, %v393_v14 }
 0x22b   : > { %876 = vrcp.f32 %v433_v40  ;;  %v426_v44 = vand.u32 7, %v424_v41  ;;  %v430_v45 = vand.u32 2147483640, %v424_v41  ;;  %v443_v46 = vsel %vm303_vm0, %v441_v43, 2147483647 }
 0x22c   : > { %v445_v47 = vshra.s32 %v443_v46, 16  ;;  %v444_v59 = vand.u32 65535, %v443_v46 }
 0x22d   : > { %v434_v48 = vmax.f32 %v430_v45, 1e-10  ;;  %vm1163_vm4 = vcmp.eq.s32.totalorder %v1148_v8, %v426_v44 }
 0x22e   : > { %v447_v50 = vcvt.s32.f32 %v445_v47  ;;  %v442_v51 = vsel %vm1163_vm4, 2147483647, %v394_v12  ;;  %v446_v61 = vcvt.s32.f32 %v444_v59 }
 0x22f   : > { %878 = vrcp.f32 %v434_v48  ;;  %v458_v52 = vsel %vm303_vm0, %v442_v51, 2147483647 }
 0x230   : > { %448 = vmin.xlane.f32.xlu0 %v447_v50  ;;  %v460_v53 = vshra.s32 %v458_v52, 16  ;;  %v459_v62 = vand.u32 65535, %v458_v52 }
 0x232   : > { %v462_v54 = vcvt.s32.f32 %v460_v53  ;;  %v461_v1 = vcvt.s32.f32 %v459_v62 }
 0x234   : > { %463 = vmin.xlane.f32.xlu1 %v462_v54 }
 0x238   : > { %v877_v55 = vpop.eup %876 }
 0x239   : > { %v437_v56 = vsel %vm1155_vm3, %v877_v55, 0.0 }
 0x23c   : > { %v879_v57 = vpop.eup %878 }
 0x23d   : > { %v438_v58 = vsel %vm1163_vm4, %v879_v57, 0.0 }
 0x2b9   : > { %v449_v60 = vpop.xlane.xlu0 %448 }
 0x2ba   : > { %vm450_vm5 = vcmp.eq.f32.partialorder %v447_v50, %v449_v60  ;;  %v455_v3 = vcvt.f32.s32 %v449_v60 }
 0x2bb   : > { %v451_v63 = vsel %vm450_vm5, %v446_v61, inf }
 0x2bc   : > { %452 = vmin.xlane.f32.xlu0 %v451_v63  ;;  %v456_v5 = vshll.u32 %v455_v3, 16 }
 0x2bd   : > { %v464_v0 = vpop.xlane.xlu1 %463 }
 0x2be   : > { %vm465_vm6 = vcmp.eq.f32.partialorder %v462_v54, %v464_v0  ;;  %v470_v6 = vcvt.f32.s32 %v464_v0 }
 0x2bf   : > { %v466_v2 = vsel %vm465_vm6, %v461_v1, inf }
 0x2c0   : > { %467 = vmin.xlane.f32.xlu1 %v466_v2  ;;  %v471_v11 = vshll.u32 %v470_v6, 16 }
 0x345   : > { %v453_v4 = vpop.xlane.xlu0 %452 }
 0x346   : > { %v454_v7 = vcvt.f32.s32 %v453_v4 }
 0x348   : > { %v457_v9 = vadd.s32 %v456_v5, %v454_v7 }
 0x349   : > { %v468_v10 = vpop.xlane.xlu1 %467 }
 0x34a   : > { %v473_v12 = vand.u32 7, %v457_v9  ;;  %v477_v13 = vand.u32 2147483640, %v457_v9  ;;  %v469_v14 = vcvt.f32.s32 %v468_v10 }
 0x34c   : > { %v481_v15 = vmax.f32 %v477_v13, 1e-10  ;;  %v472_v16 = vadd.s32 %v471_v11, %v469_v14  ;;  %vm1175_vm7 = vcmp.eq.s32.totalorder %v1148_v8, %v473_v12 }
 0x34d   : > { %v489_v18 = vsel %vm1175_vm7, 2147483647, %v441_v43  ;;  %v541_v43 = vld [vmem:[#allocation2] sm:$0xff] }
 0x34e   : > { %880 = vrcp.f32 %v481_v15  ;;  %v474_v19 = vand.u32 7, %v472_v16  ;;  %v478_v20 = vand.u32 2147483640, %v472_v16  ;;  %v491_v21 = vsel %vm303_vm0, %v489_v18, 2147483647  ;;  %807 = vmatprep.subr.mxu1 %v541_v43 }
 0x34f   : > { %v493_v22 = vshra.s32 %v491_v21, 16  ;;  %v492_v35 = vand.u32 65535, %v491_v21  ;;  %808 = vmatpush3.msra.mxu1 %v541_v43 }
 0x350   : > { %v482_v23 = vmax.f32 %v478_v20, 1e-10  ;;  %vm476_vm8 = vcmp.eq.s32.totalorder %v1148_v8, %v474_v19 }
 0x351   : > { %v495_v24 = vcvt.s32.f32 %v493_v22  ;;  %v490_v25 = vsel %vm476_vm8, 2147483647, %v442_v51  ;;  %v494_v37 = vcvt.s32.f32 %v492_v35 }
 0x352   : > { %882 = vrcp.f32 %v482_v23  ;;  %v506_v26 = vsel %vm303_vm0, %v490_v25, 2147483647 }
 0x353   : > { %496 = vmin.xlane.f32.xlu0 %v495_v24  ;;  %v508_v27 = vshra.s32 %v506_v26, 16  ;;  %v507_v38 = vand.u32 65535, %v506_v26 }
 0x355   : > { %v510_v28 = vcvt.s32.f32 %v508_v27  ;;  %v509_v41 = vcvt.s32.f32 %v507_v38 }
 0x357   : > { %511 = vmin.xlane.f32.xlu1 %v510_v28 }
 0x35b   : > { %v881_v29 = vpop.eup %880 }
 0x35c   : > { %v485_v30 = vsel %vm1175_vm7, %v881_v29, %v437_v56  ;;  %v487_v31 = vadd.f32 %v881_v29, %v877_v55 }
 0x35f   : > { %v883_v32 = vpop.eup %882 }
 0x360   : > { %v488_v33 = vadd.f32 %v883_v32, %v879_v57  ;;  %v486_v34 = vsel %vm476_vm8, %v883_v32, %v438_v58 }
 0x3dc   : > { %v497_v36 = vpop.xlane.xlu0 %496 }
 0x3dd   : > { %vm498_vm9 = vcmp.eq.f32.partialorder %v495_v24, %v497_v36  ;;  %v503_v44 = vcvt.f32.s32 %v497_v36 }
 0x3de   : > { %v499_v39 = vsel %vm498_vm9, %v494_v37, inf }
 0x3df   : > { %500 = vmin.xlane.f32.xlu0 %v499_v39  ;;  %v504_v46 = vshll.u32 %v503_v44, 16 }
 0x3e0   : > { %v512_v40 = vpop.xlane.xlu1 %511 }
 0x3e1   : > { %vm513_vm10 = vcmp.eq.f32.partialorder %v510_v28, %v512_v40  ;;  %v518_v47 = vcvt.f32.s32 %v512_v40 }
 0x3e2   : > { %v514_v42 = vsel %vm513_vm10, %v509_v41, inf }
 0x3e3   : > { %515 = vmin.xlane.f32.xlu1 %v514_v42  ;;  %v519_v51 = vshll.u32 %v518_v47, 16 }
 0x468   : > { %v501_v45 = vpop.xlane.xlu0 %500 }
 0x469   : > { %v502_v48 = vcvt.f32.s32 %v501_v45 }
 0x46b   : > { %v505_v49 = vadd.s32 %v504_v46, %v502_v48 }
 0x46c   : > { %v516_v50 = vpop.xlane.xlu1 %515 }
 0x46d   : > { %v525_v52 = vand.u32 2147483640, %v505_v49  ;;  %v517_v53 = vcvt.f32.s32 %v516_v50  ;;  %v521_v62 = vand.u32 7, %v505_v49 }
 0x46f   : > { %v529_v54 = vmax.f32 %v525_v52, 1e-10  ;;  %v520_v55 = vadd.s32 %v519_v51, %v517_v53  ;;  %vm523_vm11 = vcmp.eq.s32.totalorder %v1148_v8, %v521_v62 }
 0x471   : > { %884 = vrcp.f32 %v529_v54  ;;  %v526_v56 = vand.u32 2147483640, %v520_v55  ;;  %v522_v63 = vand.u32 7, %v520_v55 }
 0x473   : > { %v530_v57 = vmax.f32 %v526_v56, 1e-10  ;;  %vm524_vm12 = vcmp.eq.s32.totalorder %v1148_v8, %v522_v63 }
 0x475   : > { %886 = vrcp.f32 %v530_v57 }
 0x47e   : > { %v885_v58 = vpop.eup %884 }
 0x47f   : > { %v535_v59 = vadd.f32 %v885_v58, %v487_v31  ;;  %v533_v1 = vsel %vm523_vm11, %v885_v58, %v485_v30 }
 0x481   : > { %888 = vrcp.f32 %v535_v59 }
 0x482   : > { %v887_v60 = vpop.eup %886 }
 0x483   : > { %v536_v61 = vadd.f32 %v887_v60, %v488_v33  ;;  %v534_v4 = vsel %vm524_vm12, %v887_v60, %v486_v34 }
 0x485   : > { %890 = vrcp.f32 %v536_v61 }
 0x48e   : > { %v889_v0 = vpop.eup %888 }
 0x48f   : > { %v539_v2 = vmul.f32 %v889_v0, %v533_v1 }
 0x491   : > { %809 = vmatprep.mubr.msk.f32.mxu1 %vm303_vm0, %v539_v2 }
 0x492   : > { %v891_v3 = vpop.eup %890 }
 0x493   : > { %v540_v5 = vmul.f32 %v891_v3, %v534_v4 }
 0x495   : > { %810 = vmatmul.mubr.msk.f32.vlgmr.msra.gmra.mxu1 %vm303_vm0, %v540_v5 }
 0x555   : > { %v811_v6 = vpop.f32.mrf.mxu1 }
 0x556   : > { %628 = vst [vmem:[%s1143_s24 + $0x18] sm:$0xff] %v811_v6 }
 0x557   : > { %v614_v8 = vpop.f32.mrf.mxu1 }
 0x558   : > { %627 = vst [vmem:[%s1143_s24 + $0x8] sm:$0xff] %v614_v8 }
 0x559   : > { %933 = shalt.err (!%p930_p10)
}
 0x55a   : > { %s934_s5 = scalar_lea.hbm %s1197_s7, 512  ;;  %s938_s14 = scalar_lea.hbm %s1252_s4, 1024 }
 0x55b   : > { %p935_p13 = scmp.ne.s32.totalorder %s1197_s7, %s934_s5  ;;  %p939_p5 = scmp.lt.s32.totalorder %s1197_s7, %s1252_s4 }
 0x55c   : > { %p940_p6 = scmp.lt.s32.totalorder %s938_s14, %s934_s5 }
 0x55d   : > { %p936_p1 = pnand %p935_p13, %p1270_p11 }
 0x55e   : > { %p941_p8 = por %p940_p6, %p939_p5 }
 0x55f   : > { %p937_p3 = pneg %p936_p1 }
 0x561   : > { %p942_p7 = pnand %p941_p8, %p937_p3 }
 0x563   : > { %945 = shalt.err (!%p942_p7)
}
 0x564   : > { %s1004_s24 = smov 256   ;;  %s1005_s6 = smov 16  }
 0x565   : > { %814 = dma.vmem_to_hbm [thread:$0]  (%p1270_p11), %s1192_s25, 512, %s1197_s7, %s1203_s10, %s1004_s24, %s1004_s24, %s1005_s6  }
 0x566 PF: > { %p824_p12 = scmp.ge.s32.totalorder %s1000_s20, 2  ;;  %s661_s8 = sand.u32 1, %s980_s15  }
 0x567   : > { %p1271_p0 = scmp.ne.s32.totalorder %s1258_s27, 0  ;;  %s662_s9 = scalar_lea.sflag [#allocation4], %s661_s8 }
 0x569   : > { %p821_p2 = pnand %p824_p12, %p1271_p0 }
 0x56b   : > { %p822_p4 = pneg %p821_p2 }
 0x56d   : > { %975 = dma.done.wait (%p822_p4), %s662_s9, 512  }
 0x56e   : > { %977 = vsyncadd (%p822_p4), %s662_s9, 4294966784  ;;  %s18_s20 = sadd.s32 1, %s1000_s20   ;;  %s1272_s15 = smov %s984_s16 }
 0x56f   : > { %p15_p9 = scmp.ge.s32.totalorder %s18_s20, 4   ;;  %s1273_s16 = smov %s988_s17 }
 0x570   : > { %s1274_s17 = smov %s1086_s28  ;;  %s1275_s18 = smov %s996_s19 }
 0x571   : > { %s1276_s19 = smov %s1278_s23  ;;  %17 = sbr.rel (!%p15_p9) target bundleno = 5 (0x5), region = 83 }
 0x576   :  { %667 = vsyncpa [#allocation3], 1 }
 0x577   :  { %669 = vsyncpa [#allocation3 + $0x1], 1 }
 0x578   :  { %670 = vsyncpa [#allocation4], 1 }
 0x579   :  { %672 = vsyncpa [#allocation4 + $0x1], 1 }

</bundles_post_ra>
